<compile_context>
chip_gen: v5e
topology: v5e:2x2
jax: 0.10.0
libtpu: 0.0.40
codegen_flags: <defaults>
</compile_context>

<pallas_src>
import jax
import jax.numpy as jnp
from jax.experimental import pallas as pl
from jax.experimental.pallas import tpu as pltpu


def _round_up(x, m):
    return (x + m - 1) // m * m


# ----------------------------------------------------------------------------
# Kernel factory: builds the two kernel bodies sharing one fused trunk
# ----------------------------------------------------------------------------
def _make_kernels(*, dim, ncards_per_type, batch, tile_b):
    ncardtypes = len(ncards_per_type)
    offsets = []
    off = 0
    for n in ncards_per_type:
        offsets.append(off)
        off += n

    f32 = jnp.float32

    def trunk(cards, bets,
              tables_ref, w_card1_ref, b_card1_ref, w_card2_ref, b_card2_ref,
              w_card3_ref, b_card3_ref, w_b1s_ref, w_b1o_ref, b_bet1_ref,
              w_bet2_ref, b_bet2_ref, w_c1x_ref, w_c1y_ref, b_comb1_ref,
              w_comb2_ref, b_comb2_ref, w_comb3_ref, b_comb3_ref):
        tb = cards.shape[0]
        # Hoisted once per tile; reused for every card slot.
        lane = jax.lax.broadcasted_iota(jnp.int32, (tb, 52), 1)

        # ---- card trunk: fused embedding gather (one-hot matmul) + card1 ---
        x = jnp.zeros((tb, dim), f32)
        for t in range(ncardtypes):
            oh = jnp.zeros((tb, 52), f32)
            for j in range(offsets[t], offsets[t] + ncards_per_type[t]):
                col = cards[:, j:j + 1]                        # (tb, 1) int32
                valid = (col.astype(f32) >= 0.5).astype(f32)   # x.ge(0.5)
                cl = jnp.maximum(col, 0)                       # clamp(min=0)
                oh = oh + (lane == cl).astype(f32) * valid
            emb = jnp.dot(oh, tables_ref[t], preferred_element_type=f32)
            # card1 applied per-type slice => no concat of card embeddings.
            x = x + jnp.dot(emb, w_card1_ref[t * dim:(t + 1) * dim, :],
                            preferred_element_type=f32)
        x = jnp.maximum(x + b_card1_ref[...], 0.0)
        x = jnp.maximum(jnp.dot(x, w_card2_ref[...], preferred_element_type=f32)
                        + b_card2_ref[...], 0.0)
        x = jnp.maximum(jnp.dot(x, w_card3_ref[...], preferred_element_type=f32)
                        + b_card3_ref[...], 0.0)

        # ---- bet trunk: bet-feature prep fused; bet1 split avoids concat ---
        bs = jnp.clip(bets, 0.0, 1e6)
        bo = (bets >= 0.5).astype(f32)
        y = (jnp.dot(bs, w_b1s_ref[...], preferred_element_type=f32)
             + jnp.dot(bo, w_b1o_ref[...], preferred_element_type=f32)
             + b_bet1_ref[...])
        y = jnp.maximum(y, 0.0)
        y = jnp.maximum(jnp.dot(y, w_bet2_ref[...], preferred_element_type=f32)
                        + b_bet2_ref[...] + y, 0.0)

        # ---- combined trunk: comb1 split avoids concat([x, y]) -------------
        z = (jnp.dot(x, w_c1x_ref[...], preferred_element_type=f32)
             + jnp.dot(y, w_c1y_ref[...], preferred_element_type=f32)
             + b_comb1_ref[...])
        z = jnp.maximum(z, 0.0)
        z = jnp.maximum(jnp.dot(z, w_comb2_ref[...], preferred_element_type=f32)
                        + b_comb2_ref[...] + z, 0.0)
        z = jnp.maximum(jnp.dot(z, w_comb3_ref[...], preferred_element_type=f32)
                        + b_comb3_ref[...] + z, 0.0)
        return z

    def stats_kernel(cards_ref, bets_ref, *rest):
        *w_refs, stats_ref = rest
        z = trunk(cards_ref[...], bets_ref[...], *w_refs)
        tb = z.shape[0]
        # Mask batch-padding rows so the global statistics match the reference.
        row = (jax.lax.broadcasted_iota(jnp.int32, (tb, dim), 0)
               + pl.program_id(0) * tile_b)
        zm = jnp.where(row < batch, z, 0.0)
        s = jnp.sum(zm)
        ss = jnp.sum(zm * z)
        lane = jax.lax.broadcasted_iota(jnp.int32, (1, 8, 128), 2)
        stats_ref[...] = (jnp.where(lane == 0, s, 0.0)
                          + jnp.where(lane == 1, ss, 0.0))

    def head_kernel(cards_ref, bets_ref, *rest):
        *w_refs, w_head_ref, b_head_ref, norm_ref, out_ref = rest
        z = trunk(cards_ref[...], bets_ref[...], *w_refs)
        mean = norm_ref[0]
        inv_std = norm_ref[1]
        zn = (z - mean) * inv_std
        out_ref[...] = (jnp.dot(zn, w_head_ref[...], preferred_element_type=f32)
                        + b_head_ref[...])

    return stats_kernel, head_kernel


# ----------------------------------------------------------------------------
# Wrapper: batch tiling, weight preparation, two-pass normalization
# ----------------------------------------------------------------------------
def deep_cfr_forward(params, cards, bets, *, max_tile_b=512):
    dim = params["dim"]
    ncardtypes = len(cards)
    ncards_per_type = tuple(int(c.shape[1]) for c in cards)
    total_cards = sum(ncards_per_type)
    B = int(bets.shape[0])
    nbets = int(bets.shape[1])
    nactions = int(params["w_head"].shape[1])

    # Pre-combine card/rank/suit tables: combined[c] = card[c]+rank[c//4]+suit[c%4]
    cid = jnp.arange(52)
    tables = jnp.stack(
        [params["card_tbl"][t]
         + params["rank_tbl"][t][cid // 4]
         + params["suit_tbl"][t][cid % 4]
         for t in range(ncardtypes)], axis=0).astype(jnp.float32)

    # Split the weights that followed a concat in the reference model.
    w_b1s = params["w_bet1"][:nbets]
    w_b1o = params["w_bet1"][nbets:]
    w_c1x = params["w_comb1"][:dim]
    w_c1y = params["w_comb1"][dim:]

    common_weights = (
        tables, params["w_card1"], params["b_card1"],
        params["w_card2"], params["b_card2"],
        params["w_card3"], params["b_card3"],
        w_b1s, w_b1o, params["b_bet1"],
        params["w_bet2"], params["b_bet2"],
        w_c1x, w_c1y, params["b_comb1"],
        params["w_comb2"], params["b_comb2"],
        params["w_comb3"], params["b_comb3"],
    )

    # Only per-row data streams through the pipeline: raw indices + raw bets.
    cards_all = jnp.concatenate([c.astype(jnp.int32) for c in cards], axis=1)
    bets_f = bets.astype(jnp.float32)

    tile_b = min(max_tile_b, _round_up(max(B, 1), 8))
    b_pad = _round_up(B, tile_b)
    num_tiles = b_pad // tile_b
    if b_pad != B:
        pad = b_pad - B
        cards_all = jnp.pad(cards_all, ((0, pad), (0, 0)))
        bets_f = jnp.pad(bets_f, ((0, pad), (0, 0)))

    stats_kernel, head_kernel = _make_kernels(
        dim=dim, ncards_per_type=ncards_per_type, batch=B, tile_b=tile_b)

    def row_spec(feat):
        return pl.BlockSpec((tile_b, feat), lambda i: (i, 0))

    def resident(w):
        nd = w.ndim
        return pl.BlockSpec(w.shape, lambda i: (0,) * nd)

    common_specs = ([row_spec(total_cards), row_spec(nbets)]
                    + [resident(w) for w in common_weights])
    parallel = pltpu.CompilerParams(dimension_semantics=("parallel",))

    # Pass 1: masked per-tile sum / sum-of-squares of the trunk output z.
    stats = pl.pallas_call(
        stats_kernel,
        out_shape=jax.ShapeDtypeStruct((num_tiles, 8, 128), jnp.float32),
        grid=(num_tiles,),
        in_specs=common_specs,
        out_specs=pl.BlockSpec((1, 8, 128), lambda i: (i, 0, 0)),
        compiler_params=parallel,
    )(cards_all, bets_f, *common_weights)

    n = B * dim
    s_total = jnp.sum(stats[:, 0, 0])
    ss_total = jnp.sum(stats[:, 0, 1])
    mean = s_total / n
    var = (ss_total - n * mean * mean) / (n - 1)   # unbiased, matches torch.std
    inv_std = jax.lax.rsqrt(var)
    norm = jnp.stack([mean, inv_std]).astype(jnp.float32)

    # Pass 2: recompute trunk (cheaper than an HBM round-trip of z), apply the
    # global normalization and the action head.
    out = pl.pallas_call(
        head_kernel,
        out_shape=jax.ShapeDtypeStruct((b_pad, nactions), jnp.float32),
        grid=(num_tiles,),
        in_specs=(common_specs
                  + [resident(params["w_head"]), resident(params["b_head"]),
                     pl.BlockSpec(memory_space=pltpu.MemorySpace.SMEM)]),
        out_specs=row_spec(nactions),
        compiler_params=parallel,
    )(cards_all, bets_f, *common_weights, params["w_head"], params["b_head"],
      norm)

    return out[:B]


# ----------------------------------------------------------------------------
# Deterministic parameter init (shapes from DeepCFRModel.__init__)
# ----------------------------------------------------------------------------
def init_params(key, ncardtypes, nbets, nactions, dim):
    def linear_init(k, fan_in, fan_out):
        kw, kb = jax.random.split(k)
        scale = 1.0 / jnp.sqrt(float(fan_in))
        w = jax.random.uniform(kw, (fan_in, fan_out), jnp.float32, -scale, scale)
        b = jax.random.uniform(kb, (1, fan_out), jnp.float32, -scale, scale)
        return w, b

    keys = jax.random.split(key, 3 * ncardtypes + 9)
    ki = iter(range(len(keys)))

    card_tbl, rank_tbl, suit_tbl = [], [], []
    for _ in range(ncardtypes):
        card_tbl.append(jax.random.normal(keys[next(ki)], (52, dim), jnp.float32))
        rank_tbl.append(jax.random.normal(keys[next(ki)], (13, dim), jnp.float32))
        suit_tbl.append(jax.random.normal(keys[next(ki)], (4, dim), jnp.float32))

    p = {"dim": dim, "card_tbl": card_tbl, "rank_tbl": rank_tbl, "suit_tbl": suit_tbl}
    p["w_card1"], p["b_card1"] = linear_init(keys[next(ki)], dim * ncardtypes, dim)
    p["w_card2"], p["b_card2"] = linear_init(keys[next(ki)], dim, dim)
    p["w_card3"], p["b_card3"] = linear_init(keys[next(ki)], dim, dim)
    p["w_bet1"], p["b_bet1"] = linear_init(keys[next(ki)], nbets * 2, dim)
    p["w_bet2"], p["b_bet2"] = linear_init(keys[next(ki)], dim, dim)
    p["w_comb1"], p["b_comb1"] = linear_init(keys[next(ki)], 2 * dim, dim)
    p["w_comb2"], p["b_comb2"] = linear_init(keys[next(ki)], dim, dim)
    p["w_comb3"], p["b_comb3"] = linear_init(keys[next(ki)], dim, dim)
    p["w_head"], p["b_head"] = linear_init(keys[next(ki)], dim, nactions)
    return p


# ----------------------------------------------------------------------------
# Pure-JAX reference (mirrors the PyTorch forward) for a correctness check
# ----------------------------------------------------------------------------
def card_embedding(card_group, card_tbl, rank_tbl, suit_tbl, dim):
    B, num_cards = card_group.shape
    x = card_group.reshape(-1)
    valid = (x.astype(jnp.float32) >= 0.5).astype(jnp.float32)   # x.ge(0.5).float()
    xc = jnp.maximum(x, 0)                                       # clamp(min=0)
    embs = card_tbl[xc] + rank_tbl[xc // 4] + suit_tbl[xc % 4]
    embs = embs * valid[:, None]
    return embs.reshape(B, num_cards, dim).sum(axis=1)


def reference_forward(params, cards, bets):
    dim = params["dim"]
    card_embs = [
        card_embedding(cg, params["card_tbl"][i], params["rank_tbl"][i],
                       params["suit_tbl"][i], dim)
        for i, cg in enumerate(cards)
    ]
    card_feats = jnp.concatenate(card_embs, axis=1)

    def lin(x, w, b):
        return x @ w + b

    relu = jax.nn.relu
    x = relu(lin(card_feats, params["w_card1"], params["b_card1"]))
    x = relu(lin(x, params["w_card2"], params["b_card2"]))
    x = relu(lin(x, params["w_card3"], params["b_card3"]))

    bets = bets.astype(jnp.float32)
    bet_feats = jnp.concatenate(
        [jnp.clip(bets, 0.0, 1e6), (bets >= 0.5).astype(jnp.float32)], axis=1)
    y = relu(lin(bet_feats, params["w_bet1"], params["b_bet1"]))
    y = relu(lin(y, params["w_bet2"], params["b_bet2"]) + y)

    z = jnp.concatenate([x, y], axis=1)
    z = relu(lin(z, params["w_comb1"], params["b_comb1"]))
    z = relu(lin(z, params["w_comb2"], params["b_comb2"]) + z)
    z = relu(lin(z, params["w_comb3"], params["b_comb3"]) + z)
    z = (z - jnp.mean(z)) / jnp.std(z, ddof=1)   # torch.std default = unbiased
    return lin(z, params["w_head"], params["b_head"])


# ----------------------------------------------------------------------------
if __name__ == "__main__":
    ncardtypes, nbets, nactions, dim = 4, 4, 5, 32
    ncards_per_type = [2, 3, 1, 1]   # e.g. hole, flop, turn, river
    B = 2

    key = jax.random.PRNGKey(0)
    kp, kc, kb, kc2, kb2 = jax.random.split(key, 5)
    params = init_params(kp, ncardtypes, nbets, nactions, dim)

    ckeys = jax.random.split(kc, ncardtypes)
    cards = [
        jax.random.randint(ckeys[i], (B, ncards_per_type[i]), -1, 52, dtype=jnp.int32)
        for i in range(ncardtypes)
    ]
    bets = jax.random.uniform(kb, (B, nbets), jnp.float32, -1.0, 3.0)

    out = deep_cfr_forward(params, cards, bets)
    out = jax.block_until_ready(out)
    ref = reference_forward(params, cards, bets)
    assert out.shape == (B, nactions)
    assert jnp.allclose(out, ref, atol=1e-3, rtol=1e-3), (out, ref)

    # Secondary check: batch larger than one tile exercises the multi-tile
    # two-pass normalization and the batch-padding mask.
    B2 = 600
    ckeys2 = jax.random.split(kc2, ncardtypes)
    cards2 = [
        jax.random.randint(ckeys2[i], (B2, ncards_per_type[i]), -1, 52, dtype=jnp.int32)
        for i in range(ncardtypes)
    ]
    bets2 = jax.random.uniform(kb2, (B2, nbets), jnp.float32, -1.0, 3.0)
    out2 = jax.block_until_ready(deep_cfr_forward(params, cards2, bets2))
    ref2 = reference_forward(params, cards2, bets2)
    assert out2.shape == (B2, nactions)
    assert jnp.allclose(out2, ref2, atol=1e-3, rtol=1e-3)

    print("KERNEL_OK")
</pallas_src>

<mosaic_0001>
module attributes {stable_mosaic.version = 11 : i64} {
  func.func @stats_kernel(%arg0: i32, %arg1: memref<8x7xi32, #tpu.memory_space<vmem>>, %arg2: memref<8x4xf32, #tpu.memory_space<vmem>>, %arg3: memref<4x52x32xf32, #tpu.memory_space<vmem>>, %arg4: memref<128x32xf32, #tpu.memory_space<vmem>>, %arg5: memref<1x32xf32, #tpu.memory_space<vmem>>, %arg6: memref<32x32xf32, #tpu.memory_space<vmem>>, %arg7: memref<1x32xf32, #tpu.memory_space<vmem>>, %arg8: memref<32x32xf32, #tpu.memory_space<vmem>>, %arg9: memref<1x32xf32, #tpu.memory_space<vmem>>, %arg10: memref<4x32xf32, #tpu.memory_space<vmem>>, %arg11: memref<4x32xf32, #tpu.memory_space<vmem>>, %arg12: memref<1x32xf32, #tpu.memory_space<vmem>>, %arg13: memref<32x32xf32, #tpu.memory_space<vmem>>, %arg14: memref<1x32xf32, #tpu.memory_space<vmem>>, %arg15: memref<32x32xf32, #tpu.memory_space<vmem>>, %arg16: memref<32x32xf32, #tpu.memory_space<vmem>>, %arg17: memref<1x32xf32, #tpu.memory_space<vmem>>, %arg18: memref<32x32xf32, #tpu.memory_space<vmem>>, %arg19: memref<1x32xf32, #tpu.memory_space<vmem>>, %arg20: memref<32x32xf32, #tpu.memory_space<vmem>>, %arg21: memref<1x32xf32, #tpu.memory_space<vmem>>, %arg22: memref<1x8x128xf32, #tpu.memory_space<vmem>>) attributes {dimension_semantics = [#tpu.dimension_semantics<parallel>], iteration_bounds = array<i64: 1>, scalar_prefetch = 0 : i64, scratch_operands = 0 : i64, tpu.core_type = #tpu.core_type<tc>, window_params = [{transform_indices = @transform_0, window_bounds = array<i64: 8, 7>}, {transform_indices = @transform_1, window_bounds = array<i64: 8, 4>}, {pipeline_mode = #tpu.pipeline_mode<synchronous>, transform_indices = @transform_2, window_bounds = array<i64: 4, 52, 32>}, {pipeline_mode = #tpu.pipeline_mode<synchronous>, transform_indices = @transform_3, window_bounds = array<i64: 128, 32>}, {pipeline_mode = #tpu.pipeline_mode<synchronous>, transform_indices = @transform_4, window_bounds = array<i64: 1, 32>}, {pipeline_mode = #tpu.pipeline_mode<synchronous>, transform_indices = @transform_5, window_bounds = array<i64: 32, 32>}, {pipeline_mode = #tpu.pipeline_mode<synchronous>, transform_indices = @transform_6, window_bounds = array<i64: 1, 32>}, {pipeline_mode = #tpu.pipeline_mode<synchronous>, transform_indices = @transform_7, window_bounds = array<i64: 32, 32>}, {pipeline_mode = #tpu.pipeline_mode<synchronous>, transform_indices = @transform_8, window_bounds = array<i64: 1, 32>}, {pipeline_mode = #tpu.pipeline_mode<synchronous>, transform_indices = @transform_9, window_bounds = array<i64: 4, 32>}, {pipeline_mode = #tpu.pipeline_mode<synchronous>, transform_indices = @transform_10, window_bounds = array<i64: 4, 32>}, {pipeline_mode = #tpu.pipeline_mode<synchronous>, transform_indices = @transform_11, window_bounds = array<i64: 1, 32>}, {pipeline_mode = #tpu.pipeline_mode<synchronous>, transform_indices = @transform_12, window_bounds = array<i64: 32, 32>}, {pipeline_mode = #tpu.pipeline_mode<synchronous>, transform_indices = @transform_13, window_bounds = array<i64: 1, 32>}, {pipeline_mode = #tpu.pipeline_mode<synchronous>, transform_indices = @transform_14, window_bounds = array<i64: 32, 32>}, {pipeline_mode = #tpu.pipeline_mode<synchronous>, transform_indices = @transform_15, window_bounds = array<i64: 32, 32>}, {pipeline_mode = #tpu.pipeline_mode<synchronous>, transform_indices = @transform_16, window_bounds = array<i64: 1, 32>}, {pipeline_mode = #tpu.pipeline_mode<synchronous>, transform_indices = @transform_17, window_bounds = array<i64: 32, 32>}, {pipeline_mode = #tpu.pipeline_mode<synchronous>, transform_indices = @transform_18, window_bounds = array<i64: 1, 32>}, {pipeline_mode = #tpu.pipeline_mode<synchronous>, transform_indices = @transform_19, window_bounds = array<i64: 32, 32>}, {pipeline_mode = #tpu.pipeline_mode<synchronous>, transform_indices = @transform_20, window_bounds = array<i64: 1, 32>}, {transform_indices = @transform_21, window_bounds = array<i64: 1, 8, 128>}]} {
    %c0 = arith.constant 0 : index
    %c0_0 = arith.constant 0 : index
    %0 = vector.load %arg1[%c0, %c0_0] : memref<8x7xi32, #tpu.memory_space<vmem>>, vector<8x7xi32>
    %c0_1 = arith.constant 0 : index
    %c0_2 = arith.constant 0 : index
    %1 = vector.load %arg2[%c0_1, %c0_2] : memref<8x4xf32, #tpu.memory_space<vmem>>, vector<8x4xf32>
    %2 = tpu.iota {dimensions = array<i32: 1>} : vector<8x52xi32>
    %cst = arith.constant 0.000000e+00 : f32
    %3 = vector.broadcast %cst : f32 to vector<8x32xf32>
    %cst_3 = arith.constant 0.000000e+00 : f32
    %4 = vector.broadcast %cst_3 : f32 to vector<8x52xf32>
    %5 = vector.extract_strided_slice %0 {offsets = [0, 0], sizes = [8, 1], strides = [1, 1]} : vector<8x7xi32> to vector<8x1xi32>
    %6 = arith.sitofp %5 : vector<8x1xi32> to vector<8x1xf32>
    %cst_4 = arith.constant 5.000000e-01 : f32
    %7 = vector.broadcast %cst_4 : f32 to vector<8x1xf32>
    %8 = arith.cmpf oge, %6, %7 : vector<8x1xf32>
    %9 = arith.extui %8 : vector<8x1xi1> to vector<8x1xi32>
    %10 = arith.sitofp %9 : vector<8x1xi32> to vector<8x1xf32>
    %c0_i32 = arith.constant 0 : i32
    %11 = vector.broadcast %c0_i32 : i32 to vector<8x1xi32>
    %12 = arith.maxsi %5, %11 : vector<8x1xi32>
    %13 = vector.broadcast %12 : vector<8x1xi32> to vector<8x52xi32>
    %14 = arith.cmpi eq, %2, %13 : vector<8x52xi32>
    %15 = arith.extui %14 : vector<8x52xi1> to vector<8x52xi32>
    %16 = arith.sitofp %15 : vector<8x52xi32> to vector<8x52xf32>
    %17 = vector.broadcast %10 : vector<8x1xf32> to vector<8x52xf32>
    %18 = arith.mulf %16, %17 : vector<8x52xf32>
    %19 = arith.addf %4, %18 : vector<8x52xf32>
    %20 = vector.extract_strided_slice %0 {offsets = [0, 1], sizes = [8, 1], strides = [1, 1]} : vector<8x7xi32> to vector<8x1xi32>
    %21 = arith.sitofp %20 : vector<8x1xi32> to vector<8x1xf32>
    %cst_5 = arith.constant 5.000000e-01 : f32
    %22 = vector.broadcast %cst_5 : f32 to vector<8x1xf32>
    %23 = arith.cmpf oge, %21, %22 : vector<8x1xf32>
    %24 = arith.extui %23 : vector<8x1xi1> to vector<8x1xi32>
    %25 = arith.sitofp %24 : vector<8x1xi32> to vector<8x1xf32>
    %c0_i32_6 = arith.constant 0 : i32
    %26 = vector.broadcast %c0_i32_6 : i32 to vector<8x1xi32>
    %27 = arith.maxsi %20, %26 : vector<8x1xi32>
    %28 = vector.broadcast %27 : vector<8x1xi32> to vector<8x52xi32>
    %29 = arith.cmpi eq, %2, %28 : vector<8x52xi32>
    %30 = arith.extui %29 : vector<8x52xi1> to vector<8x52xi32>
    %31 = arith.sitofp %30 : vector<8x52xi32> to vector<8x52xf32>
    %32 = vector.broadcast %25 : vector<8x1xf32> to vector<8x52xf32>
    %33 = arith.mulf %31, %32 : vector<8x52xf32>
    %34 = arith.addf %19, %33 : vector<8x52xf32>
    %c0_7 = arith.constant 0 : index
    %c0_8 = arith.constant 0 : index
    %c0_9 = arith.constant 0 : index
    %35 = vector.load %arg3[%c0_7, %c0_8, %c0_9] : memref<4x52x32xf32, #tpu.memory_space<vmem>>, vector<1x52x32xf32>
    %36 = vector.shape_cast %35 : vector<1x52x32xf32> to vector<52x32xf32>
    %cst_10 = arith.constant dense<0.000000e+00> : vector<8x32xf32>
    %37 = tpu.matmul %34, %36, %cst_10 {dimension_numbers = #tpu.dot_dimension_numbers<[1], [0], [0], [1], [0, 0, 1, 1], [], []>} : vector<8x52xf32>, vector<52x32xf32>, vector<8x32xf32> -> vector<8x32xf32>
    %c0_11 = arith.constant 0 : index
    %c0_12 = arith.constant 0 : index
    %38 = vector.load %arg4[%c0_11, %c0_12] : memref<128x32xf32, #tpu.memory_space<vmem>>, vector<32x32xf32>
    %cst_13 = arith.constant dense<0.000000e+00> : vector<8x32xf32>
    %39 = tpu.matmul %37, %38, %cst_13 {dimension_numbers = #tpu.dot_dimension_numbers<[1], [0], [0], [1], [0, 0, 1, 1], [], []>} : vector<8x32xf32>, vector<32x32xf32>, vector<8x32xf32> -> vector<8x32xf32>
    %40 = arith.addf %3, %39 : vector<8x32xf32>
    %cst_14 = arith.constant 0.000000e+00 : f32
    %41 = vector.broadcast %cst_14 : f32 to vector<8x52xf32>
    %42 = vector.extract_strided_slice %0 {offsets = [0, 2], sizes = [8, 1], strides = [1, 1]} : vector<8x7xi32> to vector<8x1xi32>
    %43 = arith.sitofp %42 : vector<8x1xi32> to vector<8x1xf32>
    %cst_15 = arith.constant 5.000000e-01 : f32
    %44 = vector.broadcast %cst_15 : f32 to vector<8x1xf32>
    %45 = arith.cmpf oge, %43, %44 : vector<8x1xf32>
    %46 = arith.extui %45 : vector<8x1xi1> to vector<8x1xi32>
    %47 = arith.sitofp %46 : vector<8x1xi32> to vector<8x1xf32>
    %c0_i32_16 = arith.constant 0 : i32
    %48 = vector.broadcast %c0_i32_16 : i32 to vector<8x1xi32>
    %49 = arith.maxsi %42, %48 : vector<8x1xi32>
    %50 = vector.broadcast %49 : vector<8x1xi32> to vector<8x52xi32>
    %51 = arith.cmpi eq, %2, %50 : vector<8x52xi32>
    %52 = arith.extui %51 : vector<8x52xi1> to vector<8x52xi32>
    %53 = arith.sitofp %52 : vector<8x52xi32> to vector<8x52xf32>
    %54 = vector.broadcast %47 : vector<8x1xf32> to vector<8x52xf32>
    %55 = arith.mulf %53, %54 : vector<8x52xf32>
    %56 = arith.addf %41, %55 : vector<8x52xf32>
    %57 = vector.extract_strided_slice %0 {offsets = [0, 3], sizes = [8, 1], strides = [1, 1]} : vector<8x7xi32> to vector<8x1xi32>
    %58 = arith.sitofp %57 : vector<8x1xi32> to vector<8x1xf32>
    %cst_17 = arith.constant 5.000000e-01 : f32
    %59 = vector.broadcast %cst_17 : f32 to vector<8x1xf32>
    %60 = arith.cmpf oge, %58, %59 : vector<8x1xf32>
    %61 = arith.extui %60 : vector<8x1xi1> to vector<8x1xi32>
    %62 = arith.sitofp %61 : vector<8x1xi32> to vector<8x1xf32>
    %c0_i32_18 = arith.constant 0 : i32
    %63 = vector.broadcast %c0_i32_18 : i32 to vector<8x1xi32>
    %64 = arith.maxsi %57, %63 : vector<8x1xi32>
    %65 = vector.broadcast %64 : vector<8x1xi32> to vector<8x52xi32>
    %66 = arith.cmpi eq, %2, %65 : vector<8x52xi32>
    %67 = arith.extui %66 : vector<8x52xi1> to vector<8x52xi32>
    %68 = arith.sitofp %67 : vector<8x52xi32> to vector<8x52xf32>
    %69 = vector.broadcast %62 : vector<8x1xf32> to vector<8x52xf32>
    %70 = arith.mulf %68, %69 : vector<8x52xf32>
    %71 = arith.addf %56, %70 : vector<8x52xf32>
    %72 = vector.extract_strided_slice %0 {offsets = [0, 4], sizes = [8, 1], strides = [1, 1]} : vector<8x7xi32> to vector<8x1xi32>
    %73 = arith.sitofp %72 : vector<8x1xi32> to vector<8x1xf32>
    %cst_19 = arith.constant 5.000000e-01 : f32
    %74 = vector.broadcast %cst_19 : f32 to vector<8x1xf32>
    %75 = arith.cmpf oge, %73, %74 : vector<8x1xf32>
    %76 = arith.extui %75 : vector<8x1xi1> to vector<8x1xi32>
    %77 = arith.sitofp %76 : vector<8x1xi32> to vector<8x1xf32>
    %c0_i32_20 = arith.constant 0 : i32
    %78 = vector.broadcast %c0_i32_20 : i32 to vector<8x1xi32>
    %79 = arith.maxsi %72, %78 : vector<8x1xi32>
    %80 = vector.broadcast %79 : vector<8x1xi32> to vector<8x52xi32>
    %81 = arith.cmpi eq, %2, %80 : vector<8x52xi32>
    %82 = arith.extui %81 : vector<8x52xi1> to vector<8x52xi32>
    %83 = arith.sitofp %82 : vector<8x52xi32> to vector<8x52xf32>
    %84 = vector.broadcast %77 : vector<8x1xf32> to vector<8x52xf32>
    %85 = arith.mulf %83, %84 : vector<8x52xf32>
    %86 = arith.addf %71, %85 : vector<8x52xf32>
    %c1 = arith.constant 1 : index
    %c0_21 = arith.constant 0 : index
    %c0_22 = arith.constant 0 : index
    %87 = vector.load %arg3[%c1, %c0_21, %c0_22] : memref<4x52x32xf32, #tpu.memory_space<vmem>>, vector<1x52x32xf32>
    %88 = vector.shape_cast %87 : vector<1x52x32xf32> to vector<52x32xf32>
    %cst_23 = arith.constant dense<0.000000e+00> : vector<8x32xf32>
    %89 = tpu.matmul %86, %88, %cst_23 {dimension_numbers = #tpu.dot_dimension_numbers<[1], [0], [0], [1], [0, 0, 1, 1], [], []>} : vector<8x52xf32>, vector<52x32xf32>, vector<8x32xf32> -> vector<8x32xf32>
    %c32 = arith.constant 32 : index
    %c0_24 = arith.constant 0 : index
    %90 = vector.load %arg4[%c32, %c0_24] : memref<128x32xf32, #tpu.memory_space<vmem>>, vector<32x32xf32>
    %cst_25 = arith.constant dense<0.000000e+00> : vector<8x32xf32>
    %91 = tpu.matmul %89, %90, %cst_25 {dimension_numbers = #tpu.dot_dimension_numbers<[1], [0], [0], [1], [0, 0, 1, 1], [], []>} : vector<8x32xf32>, vector<32x32xf32>, vector<8x32xf32> -> vector<8x32xf32>
    %92 = arith.addf %40, %91 : vector<8x32xf32>
    %cst_26 = arith.constant 0.000000e+00 : f32
    %93 = vector.broadcast %cst_26 : f32 to vector<8x52xf32>
    %94 = vector.extract_strided_slice %0 {offsets = [0, 5], sizes = [8, 1], strides = [1, 1]} : vector<8x7xi32> to vector<8x1xi32>
    %95 = arith.sitofp %94 : vector<8x1xi32> to vector<8x1xf32>
    %cst_27 = arith.constant 5.000000e-01 : f32
    %96 = vector.broadcast %cst_27 : f32 to vector<8x1xf32>
    %97 = arith.cmpf oge, %95, %96 : vector<8x1xf32>
    %98 = arith.extui %97 : vector<8x1xi1> to vector<8x1xi32>
    %99 = arith.sitofp %98 : vector<8x1xi32> to vector<8x1xf32>
    %c0_i32_28 = arith.constant 0 : i32
    %100 = vector.broadcast %c0_i32_28 : i32 to vector<8x1xi32>
    %101 = arith.maxsi %94, %100 : vector<8x1xi32>
    %102 = vector.broadcast %101 : vector<8x1xi32> to vector<8x52xi32>
    %103 = arith.cmpi eq, %2, %102 : vector<8x52xi32>
    %104 = arith.extui %103 : vector<8x52xi1> to vector<8x52xi32>
    %105 = arith.sitofp %104 : vector<8x52xi32> to vector<8x52xf32>
    %106 = vector.broadcast %99 : vector<8x1xf32> to vector<8x52xf32>
    %107 = arith.mulf %105, %106 : vector<8x52xf32>
    %108 = arith.addf %93, %107 : vector<8x52xf32>
    %c2 = arith.constant 2 : index
    %c0_29 = arith.constant 0 : index
    %c0_30 = arith.constant 0 : index
    %109 = vector.load %arg3[%c2, %c0_29, %c0_30] : memref<4x52x32xf32, #tpu.memory_space<vmem>>, vector<1x52x32xf32>
    %110 = vector.shape_cast %109 : vector<1x52x32xf32> to vector<52x32xf32>
    %cst_31 = arith.constant dense<0.000000e+00> : vector<8x32xf32>
    %111 = tpu.matmul %108, %110, %cst_31 {dimension_numbers = #tpu.dot_dimension_numbers<[1], [0], [0], [1], [0, 0, 1, 1], [], []>} : vector<8x52xf32>, vector<52x32xf32>, vector<8x32xf32> -> vector<8x32xf32>
    %c64 = arith.constant 64 : index
    %c0_32 = arith.constant 0 : index
    %112 = vector.load %arg4[%c64, %c0_32] : memref<128x32xf32, #tpu.memory_space<vmem>>, vector<32x32xf32>
    %cst_33 = arith.constant dense<0.000000e+00> : vector<8x32xf32>
    %113 = tpu.matmul %111, %112, %cst_33 {dimension_numbers = #tpu.dot_dimension_numbers<[1], [0], [0], [1], [0, 0, 1, 1], [], []>} : vector<8x32xf32>, vector<32x32xf32>, vector<8x32xf32> -> vector<8x32xf32>
    %114 = arith.addf %92, %113 : vector<8x32xf32>
    %cst_34 = arith.constant 0.000000e+00 : f32
    %115 = vector.broadcast %cst_34 : f32 to vector<8x52xf32>
    %116 = vector.extract_strided_slice %0 {offsets = [0, 6], sizes = [8, 1], strides = [1, 1]} : vector<8x7xi32> to vector<8x1xi32>
    %117 = arith.sitofp %116 : vector<8x1xi32> to vector<8x1xf32>
    %cst_35 = arith.constant 5.000000e-01 : f32
    %118 = vector.broadcast %cst_35 : f32 to vector<8x1xf32>
    %119 = arith.cmpf oge, %117, %118 : vector<8x1xf32>
    %120 = arith.extui %119 : vector<8x1xi1> to vector<8x1xi32>
    %121 = arith.sitofp %120 : vector<8x1xi32> to vector<8x1xf32>
    %c0_i32_36 = arith.constant 0 : i32
    %122 = vector.broadcast %c0_i32_36 : i32 to vector<8x1xi32>
    %123 = arith.maxsi %116, %122 : vector<8x1xi32>
    %124 = vector.broadcast %123 : vector<8x1xi32> to vector<8x52xi32>
    %125 = arith.cmpi eq, %2, %124 : vector<8x52xi32>
    %126 = arith.extui %125 : vector<8x52xi1> to vector<8x52xi32>
    %127 = arith.sitofp %126 : vector<8x52xi32> to vector<8x52xf32>
    %128 = vector.broadcast %121 : vector<8x1xf32> to vector<8x52xf32>
    %129 = arith.mulf %127, %128 : vector<8x52xf32>
    %130 = arith.addf %115, %129 : vector<8x52xf32>
    %c3 = arith.constant 3 : index
    %c0_37 = arith.constant 0 : index
    %c0_38 = arith.constant 0 : index
    %131 = vector.load %arg3[%c3, %c0_37, %c0_38] : memref<4x52x32xf32, #tpu.memory_space<vmem>>, vector<1x52x32xf32>
    %132 = vector.shape_cast %131 : vector<1x52x32xf32> to vector<52x32xf32>
    %cst_39 = arith.constant dense<0.000000e+00> : vector<8x32xf32>
    %133 = tpu.matmul %130, %132, %cst_39 {dimension_numbers = #tpu.dot_dimension_numbers<[1], [0], [0], [1], [0, 0, 1, 1], [], []>} : vector<8x52xf32>, vector<52x32xf32>, vector<8x32xf32> -> vector<8x32xf32>
    %c96 = arith.constant 96 : index
    %c0_40 = arith.constant 0 : index
    %134 = vector.load %arg4[%c96, %c0_40] : memref<128x32xf32, #tpu.memory_space<vmem>>, vector<32x32xf32>
    %cst_41 = arith.constant dense<0.000000e+00> : vector<8x32xf32>
    %135 = tpu.matmul %133, %134, %cst_41 {dimension_numbers = #tpu.dot_dimension_numbers<[1], [0], [0], [1], [0, 0, 1, 1], [], []>} : vector<8x32xf32>, vector<32x32xf32>, vector<8x32xf32> -> vector<8x32xf32>
    %136 = arith.addf %114, %135 : vector<8x32xf32>
    %c0_42 = arith.constant 0 : index
    %c0_43 = arith.constant 0 : index
    %137 = vector.load %arg5[%c0_42, %c0_43] : memref<1x32xf32, #tpu.memory_space<vmem>>, vector<1x32xf32>
    %138 = vector.broadcast %137 : vector<1x32xf32> to vector<8x32xf32>
    %139 = arith.addf %136, %138 : vector<8x32xf32>
    %cst_44 = arith.constant 0.000000e+00 : f32
    %140 = vector.broadcast %cst_44 : f32 to vector<8x32xf32>
    %141 = arith.maximumf %139, %140 : vector<8x32xf32>
    %c0_45 = arith.constant 0 : index
    %c0_46 = arith.constant 0 : index
    %142 = vector.load %arg6[%c0_45, %c0_46] : memref<32x32xf32, #tpu.memory_space<vmem>>, vector<32x32xf32>
    %cst_47 = arith.constant dense<0.000000e+00> : vector<8x32xf32>
    %143 = tpu.matmul %141, %142, %cst_47 {dimension_numbers = #tpu.dot_dimension_numbers<[1], [0], [0], [1], [0, 0, 1, 1], [], []>} : vector<8x32xf32>, vector<32x32xf32>, vector<8x32xf32> -> vector<8x32xf32>
    %c0_48 = arith.constant 0 : index
    %c0_49 = arith.constant 0 : index
    %144 = vector.load %arg7[%c0_48, %c0_49] : memref<1x32xf32, #tpu.memory_space<vmem>>, vector<1x32xf32>
    %145 = vector.broadcast %144 : vector<1x32xf32> to vector<8x32xf32>
    %146 = arith.addf %143, %145 : vector<8x32xf32>
    %cst_50 = arith.constant 0.000000e+00 : f32
    %147 = vector.broadcast %cst_50 : f32 to vector<8x32xf32>
    %148 = arith.maximumf %146, %147 : vector<8x32xf32>
    %c0_51 = arith.constant 0 : index
    %c0_52 = arith.constant 0 : index
    %149 = vector.load %arg8[%c0_51, %c0_52] : memref<32x32xf32, #tpu.memory_space<vmem>>, vector<32x32xf32>
    %cst_53 = arith.constant dense<0.000000e+00> : vector<8x32xf32>
    %150 = tpu.matmul %148, %149, %cst_53 {dimension_numbers = #tpu.dot_dimension_numbers<[1], [0], [0], [1], [0, 0, 1, 1], [], []>} : vector<8x32xf32>, vector<32x32xf32>, vector<8x32xf32> -> vector<8x32xf32>
    %c0_54 = arith.constant 0 : index
    %c0_55 = arith.constant 0 : index
    %151 = vector.load %arg9[%c0_54, %c0_55] : memref<1x32xf32, #tpu.memory_space<vmem>>, vector<1x32xf32>
    %152 = vector.broadcast %151 : vector<1x32xf32> to vector<8x32xf32>
    %153 = arith.addf %150, %152 : vector<8x32xf32>
    %cst_56 = arith.constant 0.000000e+00 : f32
    %154 = vector.broadcast %cst_56 : f32 to vector<8x32xf32>
    %155 = arith.maximumf %153, %154 : vector<8x32xf32>
    %cst_57 = arith.constant 0.000000e+00 : f32
    %cst_58 = arith.constant 1.000000e+06 : f32
    %156 = vector.broadcast %cst_57 : f32 to vector<8x4xf32>
    %157 = arith.maximumf %156, %1 : vector<8x4xf32>
    %158 = vector.broadcast %cst_58 : f32 to vector<8x4xf32>
    %159 = arith.minimumf %158, %157 : vector<8x4xf32>
    %cst_59 = arith.constant 5.000000e-01 : f32
    %160 = vector.broadcast %cst_59 : f32 to vector<8x4xf32>
    %161 = arith.cmpf oge, %1, %160 : vector<8x4xf32>
    %162 = arith.extui %161 : vector<8x4xi1> to vector<8x4xi32>
    %163 = arith.sitofp %162 : vector<8x4xi32> to vector<8x4xf32>
    %c0_60 = arith.constant 0 : index
    %c0_61 = arith.constant 0 : index
    %164 = vector.load %arg10[%c0_60, %c0_61] : memref<4x32xf32, #tpu.memory_space<vmem>>, vector<4x32xf32>
    %cst_62 = arith.constant dense<0.000000e+00> : vector<8x32xf32>
    %165 = tpu.matmul %159, %164, %cst_62 {dimension_numbers = #tpu.dot_dimension_numbers<[1], [0], [0], [1], [0, 0, 1, 1], [], []>} : vector<8x4xf32>, vector<4x32xf32>, vector<8x32xf32> -> vector<8x32xf32>
    %c0_63 = arith.constant 0 : index
    %c0_64 = arith.constant 0 : index
    %166 = vector.load %arg11[%c0_63, %c0_64] : memref<4x32xf32, #tpu.memory_space<vmem>>, vector<4x32xf32>
    %cst_65 = arith.constant dense<0.000000e+00> : vector<8x32xf32>
    %167 = tpu.matmul %163, %166, %cst_65 {dimension_numbers = #tpu.dot_dimension_numbers<[1], [0], [0], [1], [0, 0, 1, 1], [], []>} : vector<8x4xf32>, vector<4x32xf32>, vector<8x32xf32> -> vector<8x32xf32>
    %168 = arith.addf %165, %167 : vector<8x32xf32>
    %c0_66 = arith.constant 0 : index
    %c0_67 = arith.constant 0 : index
    %169 = vector.load %arg12[%c0_66, %c0_67] : memref<1x32xf32, #tpu.memory_space<vmem>>, vector<1x32xf32>
    %170 = vector.broadcast %169 : vector<1x32xf32> to vector<8x32xf32>
    %171 = arith.addf %168, %170 : vector<8x32xf32>
    %cst_68 = arith.constant 0.000000e+00 : f32
    %172 = vector.broadcast %cst_68 : f32 to vector<8x32xf32>
    %173 = arith.maximumf %171, %172 : vector<8x32xf32>
    %c0_69 = arith.constant 0 : index
    %c0_70 = arith.constant 0 : index
    %174 = vector.load %arg13[%c0_69, %c0_70] : memref<32x32xf32, #tpu.memory_space<vmem>>, vector<32x32xf32>
    %cst_71 = arith.constant dense<0.000000e+00> : vector<8x32xf32>
    %175 = tpu.matmul %173, %174, %cst_71 {dimension_numbers = #tpu.dot_dimension_numbers<[1], [0], [0], [1], [0, 0, 1, 1], [], []>} : vector<8x32xf32>, vector<32x32xf32>, vector<8x32xf32> -> vector<8x32xf32>
    %c0_72 = arith.constant 0 : index
    %c0_73 = arith.constant 0 : index
    %176 = vector.load %arg14[%c0_72, %c0_73] : memref<1x32xf32, #tpu.memory_space<vmem>>, vector<1x32xf32>
    %177 = vector.broadcast %176 : vector<1x32xf32> to vector<8x32xf32>
    %178 = arith.addf %175, %177 : vector<8x32xf32>
    %179 = arith.addf %178, %173 : vector<8x32xf32>
    %cst_74 = arith.constant 0.000000e+00 : f32
    %180 = vector.broadcast %cst_74 : f32 to vector<8x32xf32>
    %181 = arith.maximumf %179, %180 : vector<8x32xf32>
    %c0_75 = arith.constant 0 : index
    %c0_76 = arith.constant 0 : index
    %182 = vector.load %arg15[%c0_75, %c0_76] : memref<32x32xf32, #tpu.memory_space<vmem>>, vector<32x32xf32>
    %cst_77 = arith.constant dense<0.000000e+00> : vector<8x32xf32>
    %183 = tpu.matmul %155, %182, %cst_77 {dimension_numbers = #tpu.dot_dimension_numbers<[1], [0], [0], [1], [0, 0, 1, 1], [], []>} : vector<8x32xf32>, vector<32x32xf32>, vector<8x32xf32> -> vector<8x32xf32>
    %c0_78 = arith.constant 0 : index
    %c0_79 = arith.constant 0 : index
    %184 = vector.load %arg16[%c0_78, %c0_79] : memref<32x32xf32, #tpu.memory_space<vmem>>, vector<32x32xf32>
    %cst_80 = arith.constant dense<0.000000e+00> : vector<8x32xf32>
    %185 = tpu.matmul %181, %184, %cst_80 {dimension_numbers = #tpu.dot_dimension_numbers<[1], [0], [0], [1], [0, 0, 1, 1], [], []>} : vector<8x32xf32>, vector<32x32xf32>, vector<8x32xf32> -> vector<8x32xf32>
    %186 = arith.addf %183, %185 : vector<8x32xf32>
    %c0_81 = arith.constant 0 : index
    %c0_82 = arith.constant 0 : index
    %187 = vector.load %arg17[%c0_81, %c0_82] : memref<1x32xf32, #tpu.memory_space<vmem>>, vector<1x32xf32>
    %188 = vector.broadcast %187 : vector<1x32xf32> to vector<8x32xf32>
    %189 = arith.addf %186, %188 : vector<8x32xf32>
    %cst_83 = arith.constant 0.000000e+00 : f32
    %190 = vector.broadcast %cst_83 : f32 to vector<8x32xf32>
    %191 = arith.maximumf %189, %190 : vector<8x32xf32>
    %c0_84 = arith.constant 0 : index
    %c0_85 = arith.constant 0 : index
    %192 = vector.load %arg18[%c0_84, %c0_85] : memref<32x32xf32, #tpu.memory_space<vmem>>, vector<32x32xf32>
    %cst_86 = arith.constant dense<0.000000e+00> : vector<8x32xf32>
    %193 = tpu.matmul %191, %192, %cst_86 {dimension_numbers = #tpu.dot_dimension_numbers<[1], [0], [0], [1], [0, 0, 1, 1], [], []>} : vector<8x32xf32>, vector<32x32xf32>, vector<8x32xf32> -> vector<8x32xf32>
    %c0_87 = arith.constant 0 : index
    %c0_88 = arith.constant 0 : index
    %194 = vector.load %arg19[%c0_87, %c0_88] : memref<1x32xf32, #tpu.memory_space<vmem>>, vector<1x32xf32>
    %195 = vector.broadcast %194 : vector<1x32xf32> to vector<8x32xf32>
    %196 = arith.addf %193, %195 : vector<8x32xf32>
    %197 = arith.addf %196, %191 : vector<8x32xf32>
    %cst_89 = arith.constant 0.000000e+00 : f32
    %198 = vector.broadcast %cst_89 : f32 to vector<8x32xf32>
    %199 = arith.maximumf %197, %198 : vector<8x32xf32>
    %c0_90 = arith.constant 0 : index
    %c0_91 = arith.constant 0 : index
    %200 = vector.load %arg20[%c0_90, %c0_91] : memref<32x32xf32, #tpu.memory_space<vmem>>, vector<32x32xf32>
    %cst_92 = arith.constant dense<0.000000e+00> : vector<8x32xf32>
    %201 = tpu.matmul %199, %200, %cst_92 {dimension_numbers = #tpu.dot_dimension_numbers<[1], [0], [0], [1], [0, 0, 1, 1], [], []>} : vector<8x32xf32>, vector<32x32xf32>, vector<8x32xf32> -> vector<8x32xf32>
    %c0_93 = arith.constant 0 : index
    %c0_94 = arith.constant 0 : index
    %202 = vector.load %arg21[%c0_93, %c0_94] : memref<1x32xf32, #tpu.memory_space<vmem>>, vector<1x32xf32>
    %203 = vector.broadcast %202 : vector<1x32xf32> to vector<8x32xf32>
    %204 = arith.addf %201, %203 : vector<8x32xf32>
    %205 = arith.addf %204, %199 : vector<8x32xf32>
    %cst_95 = arith.constant 0.000000e+00 : f32
    %206 = vector.broadcast %cst_95 : f32 to vector<8x32xf32>
    %207 = arith.maximumf %205, %206 : vector<8x32xf32>
    %208 = tpu.iota {dimensions = array<i32: 0>} : vector<8x32xi32>
    %c8_i32 = arith.constant 8 : i32
    %209 = arith.muli %arg0, %c8_i32 : i32
    %210 = vector.broadcast %209 : i32 to vector<8x32xi32>
    %211 = arith.addi %208, %210 : vector<8x32xi32>
    %c2_i32 = arith.constant 2 : i32
    %212 = vector.broadcast %c2_i32 : i32 to vector<8x32xi32>
    %213 = arith.cmpi slt, %211, %212 : vector<8x32xi32>
    %cst_96 = arith.constant 0.000000e+00 : f32
    %214 = vector.broadcast %cst_96 : f32 to vector<8x32xf32>
    %215 = arith.select %213, %207, %214 : vector<8x32xi1>, vector<8x32xf32>
    %216 = vector.shape_cast %215 : vector<8x32xf32> to vector<1x8x32xf32>
    %cst_97 = arith.constant dense<0.000000e+00> : vector<1xf32>
    %217 = vector.multi_reduction <add>, %216, %cst_97 [1, 2] : vector<1x8x32xf32> to vector<1xf32>
    %218 = vector.shape_cast %217 : vector<1xf32> to vector<1x1x1xf32>
    %219 = vector.extract %218[0, 0, 0] : f32 from vector<1x1x1xf32>
    %220 = arith.mulf %215, %207 : vector<8x32xf32>
    %221 = vector.shape_cast %220 : vector<8x32xf32> to vector<1x8x32xf32>
    %cst_98 = arith.constant dense<0.000000e+00> : vector<1xf32>
    %222 = vector.multi_reduction <add>, %221, %cst_98 [1, 2] : vector<1x8x32xf32> to vector<1xf32>
    %223 = vector.shape_cast %222 : vector<1xf32> to vector<1x1x1xf32>
    %224 = vector.extract %223[0, 0, 0] : f32 from vector<1x1x1xf32>
    %225 = tpu.iota {dimensions = array<i32: 2>} : vector<1x8x128xi32>
    %c0_i32_99 = arith.constant 0 : i32
    %226 = vector.broadcast %c0_i32_99 : i32 to vector<1x8x128xi32>
    %227 = arith.cmpi eq, %225, %226 : vector<1x8x128xi32>
    %cst_100 = arith.constant 0.000000e+00 : f32
    %228 = vector.broadcast %219 : f32 to vector<1x8x128xf32>
    %229 = vector.broadcast %cst_100 : f32 to vector<1x8x128xf32>
    %230 = arith.select %227, %228, %229 : vector<1x8x128xi1>, vector<1x8x128xf32>
    %c1_i32 = arith.constant 1 : i32
    %231 = vector.broadcast %c1_i32 : i32 to vector<1x8x128xi32>
    %232 = arith.cmpi eq, %225, %231 : vector<1x8x128xi32>
    %cst_101 = arith.constant 0.000000e+00 : f32
    %233 = vector.broadcast %224 : f32 to vector<1x8x128xf32>
    %234 = vector.broadcast %cst_101 : f32 to vector<1x8x128xf32>
    %235 = arith.select %232, %233, %234 : vector<1x8x128xi1>, vector<1x8x128xf32>
    %236 = arith.addf %230, %235 : vector<1x8x128xf32>
    %c0_102 = arith.constant 0 : index
    %c0_103 = arith.constant 0 : index
    %c0_104 = arith.constant 0 : index
    %237 = vector.load %arg22[%c0_102, %c0_103, %c0_104] : memref<1x8x128xf32, #tpu.memory_space<vmem>>, vector<1x8x128xf32>
    tpu.vector_store %arg22[%c0_102, %c0_103, %c0_104], %236 {strides = array<i32>} : memref<1x8x128xf32, #tpu.memory_space<vmem>>, vector<1x8x128xf32>,
    return
  }
  func.func @transform_0(%arg0: i32) -> (i32, i32) {
    %c0_i32 = arith.constant 0 : i32
    %c0_i32_0 = arith.constant 0 : i32
    return %arg0, %c0_i32 : i32, i32
  }
  func.func @transform_1(%arg0: i32) -> (i32, i32) {
    %c0_i32 = arith.constant 0 : i32
    %c0_i32_0 = arith.constant 0 : i32
    return %arg0, %c0_i32 : i32, i32
  }
  func.func @transform_2(%arg0: i32) -> (i32, i32, i32) {
    %c0_i32 = arith.constant 0 : i32
    %c0_i32_0 = arith.constant 0 : i32
    %c0_i32_1 = arith.constant 0 : i32
    %c0_i32_2 = arith.constant 0 : i32
    return %c0_i32, %c0_i32_0, %c0_i32_1 : i32, i32, i32
  }
  func.func @transform_3(%arg0: i32) -> (i32, i32) {
    %c0_i32 = arith.constant 0 : i32
    %c0_i32_0 = arith.constant 0 : i32
    %c0_i32_1 = arith.constant 0 : i32
    return %c0_i32, %c0_i32_0 : i32, i32
  }
  func.func @transform_4(%arg0: i32) -> (i32, i32) {
    %c0_i32 = arith.constant 0 : i32
    %c0_i32_0 = arith.constant 0 : i32
    %c0_i32_1 = arith.constant 0 : i32
    return %c0_i32, %c0_i32_0 : i32, i32
  }
  func.func @transform_5(%arg0: i32) -> (i32, i32) {
    %c0_i32 = arith.constant 0 : i32
    %c0_i32_0 = arith.constant 0 : i32
    %c0_i32_1 = arith.constant 0 : i32
    return %c0_i32, %c0_i32_0 : i32, i32
  }
  func.func @transform_6(%arg0: i32) -> (i32, i32) {
    %c0_i32 = arith.constant 0 : i32
    %c0_i32_0 = arith.constant 0 : i32
    %c0_i32_1 = arith.constant 0 : i32
    return %c0_i32, %c0_i32_0 : i32, i32
  }
  func.func @transform_7(%arg0: i32) -> (i32, i32) {
    %c0_i32 = arith.constant 0 : i32
    %c0_i32_0 = arith.constant 0 : i32
    %c0_i32_1 = arith.constant 0 : i32
    return %c0_i32, %c0_i32_0 : i32, i32
  }
  func.func @transform_8(%arg0: i32) -> (i32, i32) {
    %c0_i32 = arith.constant 0 : i32
    %c0_i32_0 = arith.constant 0 : i32
    %c0_i32_1 = arith.constant 0 : i32
    return %c0_i32, %c0_i32_0 : i32, i32
  }
  func.func @transform_9(%arg0: i32) -> (i32, i32) {
    %c0_i32 = arith.constant 0 : i32
    %c0_i32_0 = arith.constant 0 : i32
    %c0_i32_1 = arith.constant 0 : i32
    return %c0_i32, %c0_i32_0 : i32, i32
  }
  func.func @transform_10(%arg0: i32) -> (i32, i32) {
    %c0_i32 = arith.constant 0 : i32
    %c0_i32_0 = arith.constant 0 : i32
    %c0_i32_1 = arith.constant 0 : i32
    return %c0_i32, %c0_i32_0 : i32, i32
  }
  func.func @transform_11(%arg0: i32) -> (i32, i32) {
    %c0_i32 = arith.constant 0 : i32
    %c0_i32_0 = arith.constant 0 : i32
    %c0_i32_1 = arith.constant 0 : i32
    return %c0_i32, %c0_i32_0 : i32, i32
  }
  func.func @transform_12(%arg0: i32) -> (i32, i32) {
    %c0_i32 = arith.constant 0 : i32
    %c0_i32_0 = arith.constant 0 : i32
    %c0_i32_1 = arith.constant 0 : i32
    return %c0_i32, %c0_i32_0 : i32, i32
  }
  func.func @transform_13(%arg0: i32) -> (i32, i32) {
    %c0_i32 = arith.constant 0 : i32
    %c0_i32_0 = arith.constant 0 : i32
    %c0_i32_1 = arith.constant 0 : i32
    return %c0_i32, %c0_i32_0 : i32, i32
  }
  func.func @transform_14(%arg0: i32) -> (i32, i32) {
    %c0_i32 = arith.constant 0 : i32
    %c0_i32_0 = arith.constant 0 : i32
    %c0_i32_1 = arith.constant 0 : i32
    return %c0_i32, %c0_i32_0 : i32, i32
  }
  func.func @transform_15(%arg0: i32) -> (i32, i32) {
    %c0_i32 = arith.constant 0 : i32
    %c0_i32_0 = arith.constant 0 : i32
    %c0_i32_1 = arith.constant 0 : i32
    return %c0_i32, %c0_i32_0 : i32, i32
  }
  func.func @transform_16(%arg0: i32) -> (i32, i32) {
    %c0_i32 = arith.constant 0 : i32
    %c0_i32_0 = arith.constant 0 : i32
    %c0_i32_1 = arith.constant 0 : i32
    return %c0_i32, %c0_i32_0 : i32, i32
  }
  func.func @transform_17(%arg0: i32) -> (i32, i32) {
    %c0_i32 = arith.constant 0 : i32
    %c0_i32_0 = arith.constant 0 : i32
    %c0_i32_1 = arith.constant 0 : i32
    return %c0_i32, %c0_i32_0 : i32, i32
  }
  func.func @transform_18(%arg0: i32) -> (i32, i32) {
    %c0_i32 = arith.constant 0 : i32
    %c0_i32_0 = arith.constant 0 : i32
    %c0_i32_1 = arith.constant 0 : i32
    return %c0_i32, %c0_i32_0 : i32, i32
  }
  func.func @transform_19(%arg0: i32) -> (i32, i32) {
    %c0_i32 = arith.constant 0 : i32
    %c0_i32_0 = arith.constant 0 : i32
    %c0_i32_1 = arith.constant 0 : i32
    return %c0_i32, %c0_i32_0 : i32, i32
  }
  func.func @transform_20(%arg0: i32) -> (i32, i32) {
    %c0_i32 = arith.constant 0 : i32
    %c0_i32_0 = arith.constant 0 : i32
    %c0_i32_1 = arith.constant 0 : i32
    return %c0_i32, %c0_i32_0 : i32, i32
  }
  func.func @transform_21(%arg0: i32) -> (i32, i32, i32) {
    %c0_i32 = arith.constant 0 : i32
    %c0_i32_0 = arith.constant 0 : i32
    %c0_i32_1 = arith.constant 0 : i32
    return %arg0, %c0_i32, %c0_i32_0 : i32, i32, i32
  }
}

</mosaic_0001>

<bundles_post_ra>
// kernel: tpu_custom_call.1
= control target key start
LH: loop header
LB: loop body
LE: loop exit
PB: predicated region body
PF: predicated region fallthrough
CT: control target
= control target key end

     0   :  { %s1302_s0 = inlined_call_operand.vmem [shape: s32[8,7], index: 0, kind: input, shape index: {}]   ;;  %s1303_s1 = inlined_call_operand.vmem [shape: f32[8,4], index: 1, kind: input, shape index: {}]   ;;  %s1304_s2 = inlined_call_operand.vmem [shape: f32[4,52,32], index: 2, kind: input, shape index: {}]   ;;  %s1305_s3 = inlined_call_operand.vmem [shape: f32[128,32], index: 3, kind: input, shape index: {}]   ;;  %s1306_s4 = inlined_call_operand.vmem [shape: f32[1,32], index: 4, kind: input, shape index: {}]   ;;  %s1307_s5 = inlined_call_operand.vmem [shape: f32[32,32], index: 5, kind: input, shape index: {}]   ;;  %s1308_s6 = inlined_call_operand.vmem [shape: f32[1,32], index: 6, kind: input, shape index: {}]   ;;  %s1309_s7 = inlined_call_operand.vmem [shape: f32[32,32], index: 7, kind: input, shape index: {}]   ;;  %s1310_s8 = inlined_call_operand.vmem [shape: f32[1,32], index: 8, kind: input, shape index: {}]   ;;  %s1311_s9 = inlined_call_operand.vmem [shape: f32[4,32], index: 9, kind: input, shape index: {}]   ;;  %s1312_s10 = inlined_call_operand.vmem [shape: f32[4,32], index: 10, kind: input, shape index: {}]   ;;  %s1313_s11 = inlined_call_operand.vmem [shape: f32[1,32], index: 11, kind: input, shape index: {}]   ;;  %s1314_s12 = inlined_call_operand.vmem [shape: f32[32,32], index: 12, kind: input, shape index: {}]   ;;  %s1315_s13 = inlined_call_operand.vmem [shape: f32[1,32], index: 13, kind: input, shape index: {}]   ;;  %s1316_s14 = inlined_call_operand.vmem [shape: f32[32,32], index: 14, kind: input, shape index: {}]   ;;  %s1317_s15 = inlined_call_operand.vmem [shape: f32[32,32], index: 15, kind: input, shape index: {}]   ;;  %s1318_s16 = inlined_call_operand.vmem [shape: f32[1,32], index: 16, kind: input, shape index: {}]   ;;  %s1319_s17 = inlined_call_operand.vmem [shape: f32[32,32], index: 17, kind: input, shape index: {}]   ;;  %s1320_s18 = inlined_call_operand.vmem [shape: f32[1,32], index: 18, kind: input, shape index: {}]   ;;  %s1321_s19 = inlined_call_operand.vmem [shape: f32[32,32], index: 19, kind: input, shape index: {}]   ;;  %s1322_s20 = inlined_call_operand.vmem [shape: f32[1,32], index: 20, kind: input, shape index: {}]   ;;  %s1323_s21 = inlined_call_operand.hbm [shape: f32[1,8,128], index: 21, kind: output, shape index: {}]  }
   0x1   :  { %1327 = sst [smem:[#allocation5_spill]] %s1302_s0 }
   0x2   :  { %1328 = sst [smem:[#allocation6_spill]] %s1303_s1 }
   0x3   :  { %1329 = sst [smem:[#allocation7_spill]] %s1304_s2 }
   0x4   :  { %1330 = sst [smem:[#allocation8_spill]] %s1305_s3 }
   0x5   :  { %1331 = sst [smem:[#allocation9_spill]] %s1306_s4 }
   0x6   :  { %1332 = sst [smem:[#allocation10_spill]] %s1307_s5 }
   0x7   :  { %s1333_s26 = sld [smem:[#allocation5_spill]]  ;;  %v872_v1 = vmov 2   ;;  %v873_v4 = vmov 4   ;;  %v874_v5 = vmov 0.0  }
   0x8   :  { %825 = vset.pattern.permute.xlu0 %v872_v1  ;;  %827 = vset.pattern.permute.xlu1 %v872_v1 }
   0x9   :  { %829 = vset.pattern.permute.xlu2 %v873_v4 }
   0xd   :  { %v69_v0 = vld [vmem:[%s1333_s26] sm:$0xff] }
   0xe   :  { %vm77_vm0 = vcmp.gt.s32.totalorder %v69_v0, 0  ;;  %v73_v2 = vcvt.s32.f32 %v69_v0 }
   0xf   :  { %v994_v3 = vsel %vm77_vm0, %v69_v0, 0 }
  0x10   :  { %144 = vperm.xlu0 %825, %v994_v3   ;;  %vm74_vm1 = vcmp.ge.f32.partialorder %v73_v2, 0.5  ;;  %168 = vperm.xlu2 %829, %v994_v3  }
  0x11   :  { %v759_v6 = vsel %vm74_vm1, 1.0, %v874_v5 }
  0x12   :  { %150 = vperm.xlu1 %827, %v759_v6  }
  0x13   :  { %26 = vsyncpa [#allocation3], 0  ;;  %v875_v7 = vmov 3   ;;  %v876_v8 = vmov 1   ;;  %v877_v9 = vmov 0   ;;  %vm115_vm2 = vcmask 1043456  }
  0x14   :  { %s1334_s28 = sld [smem:[#allocation7_spill]]  ;;  %v71_v22 = vlaneseq  ;;  %v878_v27 = vmov 5   ;;  %v879_v31 = vmov 6   ;;  %vm111_vm6 = vcmask 424960  }
  0x15   :  { %s1335_s29 = sld [smem:[#allocation8_spill]]  ;;  %vm217_vm10 = vcmask 261120   ;;  %vm489_vm12 = vcmask 31744  }
  0x16   :  { %v1047_v28 = vand.u32 127, %v71_v22  ;;  %s1336_s1 = sld [smem:[#allocation10_spill]] }
  0x17   :  { %s1337_s22 = sld [smem:[#allocation6_spill]] }
  0x18   :  { %826 = vset.pattern.permute.xlu0 %v875_v7  ;;  %174 = vperm.xlu2 %829, %v759_v6   ;;  %s1338_s24 = sld [smem:[#allocation9_spill]]  ;;  %vm735_vm15 = vcmp.eq.s32.totalorder %v1047_v28, 0  ;;  %vm738_vm0 = vcmp.eq.s32.totalorder %v1047_v28, 1 }
  0x19   :  { %156 = vperm.xlu0 %826, %v994_v3  }
  0x1a   :  { %828 = vset.pattern.permute.xlu1 %v875_v7  ;;  %v773_v10 = vld [vmem:[%s1334_s28 + $0x68] sm:$0xf]  ;;  %v772_v11 = vld [vmem:[%s1334_s28 + $0x60] sm:$0xff]  ;;  %v771_v12 = vld [vmem:[%s1334_s28 + $0x58] sm:$0xff] }
  0x1b   :  { %162 = vperm.xlu1 %828, %v759_v6   ;;  %774 = vmatpush.msk.msra.mxu1 %vm115_vm2, %v773_v10  ;;  %v770_v13 = vld [vmem:[%s1334_s28 + $0x50] sm:$0xff]  ;;  %v769_v14 = vld [vmem:[%s1334_s28 + $0x48] sm:$0xff]  ;;  %v768_v15 = vld [vmem:[%s1334_s28 + $0x40] sm:$0xff] }
  0x1c   :  { %v767_v16 = vld [vmem:[%s1334_s28 + $0x38] sm:$0xff]  ;;  %v110_v17 = vld [vmem:[%s1334_s28 + $0x30] sm:$0xf]  ;;  %v109_v18 = vld [vmem:[%s1334_s28 + $0x28] sm:$0xff] }
  0x1d   :  { %203 = vmatpush.msra.mxu1 %v772_v11  ;;  %762 = vmatpush.msk.msra.mxu0 %vm115_vm2, %v110_v17  ;;  %v108_v19 = vld [vmem:[%s1334_s28 + $0x20] sm:$0xff]  ;;  %v107_v20 = vld [vmem:[%s1334_s28 + $0x18] sm:$0xff]  ;;  %v106_v21 = vld [vmem:[%s1334_s28 + $0x10] sm:$0xff] }
  0x1e   :  { %v105_v23 = vld [vmem:[%s1334_s28 + $0x8] sm:$0xff]  ;;  %v104_v25 = vld [vmem:[%s1334_s28] sm:$0xff]  ;;  %v216_v30 = vld [vmem:[%s1335_s29 + $0x38] sm:$0xff] }
  0x1f   :  { %204 = vmatpush.msra.mxu1 %v771_v12  ;;  %129 = vmatpush.msra.mxu0 %v109_v18  ;;  %v215_v32 = vld [vmem:[%s1335_s29 + $0x30] sm:$0xff]  ;;  %v214_v33 = vld [vmem:[%s1335_s29 + $0x28] sm:$0xff]  ;;  %v213_v34 = vld [vmem:[%s1335_s29 + $0x20] sm:$0xff] }
  0x20   :  { %831 = vset.pattern.permute.xlu2 %v876_v8  ;;  %233 = vmatpush.msra.mxu2 %v216_v30  ;;  %v785_v35 = vld [vmem:[%s1334_s28 + $0xa0] sm:$0xf]  ;;  %v784_v38 = vld [vmem:[%s1334_s28 + $0x98] sm:$0xff]  ;;  %v783_v57 = vld [vmem:[%s1334_s28 + $0x90] sm:$0xff] }
  0x21   :  { %832 = vset.pattern.permute.xlu0 %v877_v9  ;;  %93 = vperm.xlu2 %831, %v994_v3   ;;  %v782_v58 = vld [vmem:[%s1334_s28 + $0x88] sm:$0xff]  ;;  %v781_v59 = vld [vmem:[%s1334_s28 + $0x80] sm:$0xff]  ;;  %v780_v60 = vld [vmem:[%s1334_s28 + $0x78] sm:$0xff] }
  0x22   :  { %87 = vperm.xlu0 %832, %v759_v6   ;;  %205 = vmatpush.msra.mxu1 %v770_v13  ;;  %v779_v61 = vld [vmem:[%s1334_s28 + $0x70] sm:$0xff]  ;;  %v142_v63 = vld [vmem:[%s1335_s29 + $0x18] sm:$0xff]  ;;  %v794_v4 = vld [vmem:[%s1334_s28 + $0xc8] sm:$0xff] }
  0x23   :  { %830 = vset.pattern.permute.xlu1 %v877_v9  ;;  %130 = vmatpush.msra.mxu0 %v108_v19  ;;  %v796_v0 = vld [vmem:[%s1334_s28 + $0xd8] sm:$0xf]  ;;  %v141_v1 = vld [vmem:[%s1335_s29 + $0x10] sm:$0xff]  ;;  %v793_v7 = vld [vmem:[%s1334_s28 + $0xc0] sm:$0xff] }
  0x24   :  { %80 = vperm.xlu1 %830, %v994_v3   ;;  %206 = vmatpush.msra.mxu1 %v769_v14  ;;  %v795_v2 = vld [vmem:[%s1334_s28 + $0xd0] sm:$0xff]  ;;  %v790_v13 = vld [vmem:[%s1334_s28 + $0xa8] sm:$0xff] }
  0x25   :  { %131 = vmatpush.msra.mxu0 %v107_v20  ;;  %234 = vmatpush.msra.mxu2 %v215_v32  ;;  %v791_v10 = vld [vmem:[%s1334_s28 + $0xb0] sm:$0xff]  ;;  %v313_v20 = vld [vmem:[%s1335_s29 + $0x58] sm:$0xff] }
  0x26   :  { %207 = vmatpush.msra.mxu1 %v768_v15  ;;  %256 = vmatpush.msra.mxu3 %v142_v63 }
  0x27   :  { %132 = vmatpush.msra.mxu0 %v106_v21  ;;  %235 = vmatpush.msra.mxu2 %v214_v33  ;;  %v312_v21 = vld [vmem:[%s1335_s29 + $0x50] sm:$0xff]  ;;  %v421_v33 = vld [vmem:[%s1336_s1 + $0x18] sm:$0xff] }
  0x28   :  { %208 = vmatpush.msra.mxu1 %v767_v16  ;;  %257 = vmatpush.msra.mxu3 %v141_v1  ;;  %v840_v1 = vld [vmem:[%s1313_s11] ss:$0 sm:$0xff] }
  0x29   :  { %133 = vmatpush.msra.mxu0 %v105_v23  ;;  %834 = vset.pattern.permute.xlu2 %v878_v27  ;;  %v311_v23 = vld [vmem:[%s1335_s29 + $0x48] sm:$0xff] }
  0x2a   :  { %837 = vset.pattern.permute.xlu0 %v879_v31  ;;  %265 = vperm.xlu2 %834, %v994_v3  }
  0x2b   :  { %134 = vmatpush.msra.mxu0 %v104_v25  ;;  %345 = vperm.xlu0 %837, %v759_v6   ;;  %v387_v25 = vld [vmem:[%s1335_s29 + $0x78] sm:$0xff] }
  0x2c   :  { %833 = vset.pattern.permute.xlu1 %v876_v8  ;;  %236 = vmatpush.msra.mxu2 %v213_v34  ;;  %v792_v8 = vld [vmem:[%s1334_s28 + $0xb8] sm:$0xff]  ;;  %v420_v34 = vld [vmem:[%s1336_s1 + $0x10] sm:$0xff] }
  0x2d   :  { %99 = vperm.xlu1 %833, %v759_v6   ;;  %797 = vmatpush.msk.msrb.mxu0 %vm115_vm2, %v796_v0 }
  0x2e   :  { %786 = vmatpush.msk.msrb.mxu2 %vm115_vm2, %v785_v35  ;;  %403 = vmatpush.msrb.mxu1 %v387_v25  ;;  %v419_v35 = vld [vmem:[%s1336_s1 + $0x8] sm:$0xff]  ;;  %v643_v25 = vld [vmem:[%s1319_s17 + $0x10] sm:$0xff] }
  0x2f   :  { %374 = vmatpush.msrb.mxu0 %v795_v2 }
  0x30   :  { %300 = vmatpush.msrb.mxu2 %v784_v38  ;;  %v487_v38 = vld [vmem:[%s1311_s9] sm:$0xf] }
  0x31   :  { %375 = vmatpush.msrb.mxu0 %v794_v4 }
  0x32   :  { %836 = vset.pattern.permute.xlu2 %v879_v31  ;;  %301 = vmatpush.msrb.mxu2 %v783_v57  ;;  %v549_v57 = vld [vmem:[%s1314_s12 + $0x8] sm:$0xff] }
  0x33   :  { %339 = vperm.xlu2 %836, %v994_v3   ;;  %v140_v3 = vld [vmem:[%s1335_s29 + $0x8] sm:$0xff]  ;;  %376 = vmatpush.msrb.mxu0 %v793_v7  ;;  %v583_v7 = vld [vmem:[%s1316_s14 + $0x10] sm:$0xff] }
  0x34   :  { %302 = vmatpush.msrb.mxu2 %v782_v58  ;;  %258 = vmatpush.msra.mxu3 %v140_v3  ;;  %v548_v58 = vld [vmem:[%s1314_s12] sm:$0xff] }
  0x35   :  { %835 = vset.pattern.permute.xlu1 %v878_v27  ;;  %377 = vmatpush.msrb.mxu0 %v792_v8  ;;  %v385_v27 = vld [vmem:[%s1335_s29 + $0x68] sm:$0xff] }
  0x36   :  { %271 = vperm.xlu1 %835, %v759_v6   ;;  %303 = vmatpush.msrb.mxu2 %v781_v59  ;;  %v139_v6 = vld [vmem:[%s1335_s29] sm:$0xff]  ;;  %v584_v59 = vld [vmem:[%s1316_s14 + $0x18] sm:$0xff]  ;;  %v582_v8 = vld [vmem:[%s1316_s14 + $0x8] sm:$0xff] }
  0x37   :  { %259 = vmatpush.msra.mxu3 %v139_v6  ;;  %378 = vmatpush.msrb.mxu0 %v791_v10  ;;  %v588_v10 = vld [vmem:[%s1317_s15 + $0x18] sm:$0xff] }
  0x38   :  { %304 = vmatpush.msrb.mxu2 %v780_v60  ;;  %v839_v60 = vld [vmem:[%s1308_s6] ss:$0 sm:$0xff] }
  0x39   :  { %379 = vmatpush.msrb.mxu0 %v790_v13  ;;  %329 = vmatpush.msrb.mxu3 %v313_v20  ;;  %v585_v13 = vld [vmem:[%s1317_s15] sm:$0xff] }
  0x3a   :  { %305 = vmatpush.msrb.mxu2 %v779_v61 }
  0x3b   :  { %330 = vmatpush.msrb.mxu3 %v312_v21 }
  0x3d   :  { %331 = vmatpush.msrb.mxu3 %v311_v23 }
  0x6a   :  { %v169_v26 = vpop.permute.xlu2 %168 }
  0x6b   :  { %vm170_vm4 = vcmp.eq.s32.totalorder %v1047_v28, %v169_v26  ;;  %v386_v26 = vld [vmem:[%s1335_s29 + $0x70] sm:$0xff] }
  0x6c   :  { %v766_v39 = vsel %vm170_vm4, 1.0, %v874_v5  ;;  %404 = vmatpush.msrb.mxu1 %v386_v26  ;;  %v642_v26 = vld [vmem:[%s1319_s17 + $0x8] sm:$0xff] }
  0x6e   :  { %405 = vmatpush.msrb.mxu1 %v385_v27  ;;  %v641_v27 = vld [vmem:[%s1319_s17] sm:$0xff] }
  0x72   :  { %v175_v40 = vpop.permute.xlu2 %174 }
  0x73   :  { %v177_v45 = vmul.f32 %v766_v39, %v175_v40  ;;  %v70_v39 = vld [vmem:[%s1337_s22] sm:$0xff] }
  0x74   :  { %vm484_vm13 = vcmp.ge.f32.partialorder %v70_v39, 0.5 }
  0x75   :  { %v802_v40 = vsel %vm484_vm13, 1.0, %v874_v5 }
  0x7b   :  { %v94_v49 = vpop.permute.xlu2 %93 }
  0x7c   :  { %vm95_vm8 = vcmp.eq.s32.totalorder %v1047_v28, %v94_v49 }
  0x7d   :  { %v761_v52 = vsel %vm95_vm8, 1.0, %v874_v5 }
  0x82   :  { %v145_v24 = vpop.permute.xlu0 %144 }
  0x83   :  { %vm146_vm3 = vcmp.eq.s32.totalorder %v1047_v28, %v145_v24  ;;  %v310_v24 = vld [vmem:[%s1335_s29 + $0x40] sm:$0xff] }
  0x84   :  { %v151_v29 = vpop.permute.xlu1 %150  ;;  %v764_v36 = vsel %vm146_vm3, 1.0, %v874_v5  ;;  %v266_v62 = vpop.permute.xlu2 %265  ;;  %332 = vmatpush.msrb.mxu3 %v310_v24  ;;  %v644_v24 = vld [vmem:[%s1319_s17 + $0x18] sm:$0xff] }
  0x85   :  { %v153_v43 = vmul.f32 %v764_v36, %v151_v29  ;;  %vm267_vm11 = vcmp.eq.s32.totalorder %v1047_v28, %v266_v62  ;;  %v384_v29 = vld [vmem:[%s1335_s29 + $0x60] sm:$0xff] }
  0x86   :  { %v778_v16 = vsel %vm267_vm11, 1.0, %v874_v5  ;;  %406 = vmatpush.msrb.mxu1 %v384_v29  ;;  %v418_v36 = vld [vmem:[%s1336_s1] sm:$0xff]  ;;  %v677_v29 = vld [vmem:[%s1321_s19 + $0x18] sm:$0xff] }
  0x8b   :  { %v157_v37 = vpop.permute.xlu0 %156 }
  0x8c   :  { %vm158_vm5 = vcmp.eq.s32.totalorder %v1047_v28, %v157_v37  ;;  %v488_v37 = vld [vmem:[%s1312_s10] sm:$0xf] }
  0x8d   :  { %v765_v41 = vsel %vm158_vm5, 1.0, %v874_v5  ;;  %v163_v42 = vpop.permute.xlu1 %162  ;;  %v340_v9 = vpop.permute.xlu2 %339 }
  0x8e   :  { %v165_v44 = vmul.f32 %v765_v41, %v163_v42  ;;  %vm341_vm9 = vcmp.eq.s32.totalorder %v1047_v28, %v340_v9  ;;  %v453_v41 = vld [vmem:[%s1309_s7 + $0x18] sm:$0xff]  ;;  %v581_v9 = vld [vmem:[%s1316_s14] sm:$0xff] }
  0x8f   :  { %v789_v12 = vsel %vm341_vm9, 1.0, %v874_v5 }
  0x90   :  { %v166_v46 = vadd.f32 %v165_v44, %v153_v43 }
  0x92   :  { %v178_v47 = vadd.f32 %v177_v45, %v166_v46 }
  0x94   :  { %775 = vmatmul.msk.f32.vlgmr.msra.gmra.mxu1 %vm111_vm6, %v178_v47  ;;  %v88_v50 = vpop.permute.xlu0 %87  ;;  %v838_v47 = vld [vmem:[%s1338_s24] ss:$0 sm:$0xff] }
  0x95   :  { %473 = vmatpush.msra.mxu1 %v453_v41 }
  0x96   :  { %v81_v48 = vpop.permute.xlu1 %80 }
  0x97   :  { %vm82_vm7 = vcmp.eq.s32.totalorder %v1047_v28, %v81_v48 }
  0x98   :  { %v760_v51 = vsel %vm82_vm7, 1.0, %v874_v5  ;;  %v482_v5 = vmax.f32 %v70_v39, 0.0  ;;  %v844_v39 = vld [vmem:[%s1320_s18] ss:$0 sm:$0xff] }
  0x99   :  { %v90_v53 = vmul.f32 %v760_v51, %v88_v50 }
  0x9a   :  { %v483_v51 = vmin.f32 %v482_v5, 1000000.0 }
  0x9d   :  { %v346_v11 = vpop.permute.xlu0 %345 }
  0x9e   :  { %v348_v14 = vmul.f32 %v789_v12, %v346_v11  ;;  %v587_v11 = vld [vmem:[%s1317_s15 + $0x10] sm:$0xff]  ;;  %v586_v12 = vld [vmem:[%s1317_s15 + $0x8] sm:$0xff] }
  0x9f   :  { %v100_v54 = vpop.permute.xlu1 %99 }
  0xa0   :  { %v102_v55 = vmul.f32 %v761_v52, %v100_v54  ;;  %v452_v52 = vld [vmem:[%s1309_s7 + $0x10] sm:$0xff]  ;;  %v450_v54 = vld [vmem:[%s1309_s7] sm:$0xff] }
  0xa1   :  { %474 = vmatpush.msra.mxu1 %v452_v52 }
  0xa2   :  { %v103_v56 = vadd.f32 %v102_v55, %v90_v53  ;;  %v451_v53 = vld [vmem:[%s1309_s7 + $0x8] sm:$0xff]  ;;  %v551_v55 = vld [vmem:[%s1314_s12 + $0x18] sm:$0xff]  ;;  %s750_s7 = sshll.u32 %s1323_s21, 4  ;;  %s751_s7 = int_to_ptr.hbm [resolvable:$true] %s750_s7 }
  0xa3   :  { %475 = vmatpush.msra.mxu1 %v451_v53 }
  0xa4   :  { %763 = vmatmul.msk.f32.vlgmr.msra.gmra.mxu0 %vm111_vm6, %v103_v56  ;;  %v550_v56 = vld [vmem:[%s1314_s12 + $0x10] sm:$0xff] }
  0xa5   :  { %476 = vmatpush.msra.mxu1 %v450_v54  ;;  %571 = vmatpush.msra.mxu0 %v551_v55 }
  0xa7   :  { %572 = vmatpush.msra.mxu0 %v550_v56 }
  0xa8   :  { %v272_v17 = vpop.permute.xlu1 %271 }
  0xa9   :  { %v274_v18 = vmul.f32 %v778_v16, %v272_v17  ;;  %573 = vmatpush.msra.mxu0 %v549_v57 }
  0xab   :  { %574 = vmatpush.msra.mxu0 %v548_v58 }
  0xac   :  { %798 = vmatmul.msk.f32.vlgmr.msrb.gmra.mxu0 %vm111_vm6, %v348_v14  ;;  %v841_v14 = vld [vmem:[%s1310_s8] ss:$0 sm:$0xff] }
  0xad   :  { %697 = vmatpush.msrb.mxu0 %v677_v29 }
 0x111   :  { %v210_v15 = vpop.f32.mrf.mxu1 }
 0x112   :  { %776 = vmatmul.msk.f32.vlgmr.msra.gmra.mxu2 %vm217_vm10, %v210_v15 }
 0x113   :  { %803 = vmatpush.msk.msra.mxu2 %vm115_vm2, %v488_v37  ;;  %v675_v37 = vld [vmem:[%s1321_s19 + $0x8] sm:$0xff] }
 0x11a   :  { %787 = vmatmul.msk.f32.vlgmr.msrb.gmra.mxu2 %vm111_vm6, %v274_v18  ;;  %v842_v18 = vld [vmem:[%s1315_s13] ss:$0 sm:$0xff] }
 0x11b   :  { %627 = vmatpush.msrb.mxu2 %v584_v59 }
 0x11d   :  { %628 = vmatpush.msrb.mxu2 %v583_v7 }
 0x11f   :  { %629 = vmatpush.msrb.mxu2 %v582_v8 }
 0x121   :  { %v136_v19 = vpop.f32.mrf.mxu0  ;;  %630 = vmatpush.msrb.mxu2 %v581_v9 }
 0x122   :  { %777 = vmatmul.msk.f32.vlgmr.msra.gmra.mxu3 %vm217_vm10, %v136_v19  ;;  %804 = vmatmul.msk.f32.vlgmr.msra.gmra.mxu2 %vm489_vm12, %v802_v40 }
 0x123   :  { %441 = vmatpush.msra.mxu3 %v421_v33 }
 0x125   :  { %442 = vmatpush.msra.mxu3 %v420_v34 }
 0x127   :  { %443 = vmatpush.msra.mxu3 %v419_v35 }
 0x129   :  { %v381_v30 = vpop.f32.mrf.mxu0  ;;  %444 = vmatpush.msra.mxu3 %v418_v36  ;;  %v676_v36 = vld [vmem:[%s1321_s19 + $0x10] sm:$0xff] }
 0x12a   :  { %799 = vmatmul.msk.f32.vlgmr.msrb.gmra.mxu1 %vm217_vm10, %v381_v30  ;;  %v843_v30 = vld [vmem:[%s1318_s16] ss:$0 sm:$0xff]  ;;  %698 = vmatpush.msrb.mxu0 %v676_v36 }
 0x12b   :  { %604 = vmatpush.msrb.mxu1 %v588_v10 }
 0x12c   :  { %699 = vmatpush.msrb.mxu0 %v675_v37 }
 0x12d   :  { %605 = vmatpush.msrb.mxu1 %v587_v11 }
 0x12f   :  { %606 = vmatpush.msrb.mxu1 %v586_v12 }
 0x131   :  { %607 = vmatpush.msrb.mxu1 %v585_v13 }
 0x195   :  { %v238_v31 = vpop.f32.mrf.mxu2 }
 0x19d   :  { %v307_v32 = vpop.f32.mrf.mxu2 }
 0x19e   :  { %788 = vmatmul.msk.f32.vlgmr.msrb.gmra.mxu3 %vm217_vm10, %v307_v32 }
 0x19f   :  { %805 = vmatpush.msk.msrb.mxu3 %vm115_vm2, %v487_v38  ;;  %v674_v38 = vld [vmem:[%s1321_s19] sm:$0xff]  ;;  %s880_s19 = smov [#allocation2]  }
 0x1a0   :  { %700 = vmatpush.msrb.mxu0 %v674_v38 }
 0x1a5   :  { %v261_v42 = vpop.f32.mrf.mxu3  ;;  %v513_v0 = vpop.f32.mrf.mxu2 }
 0x1a6   :  { %v262_v43 = vadd.f32 %v261_v42, %v238_v31 }
 0x1a7   :  { %v408_v45 = vpop.f32.mrf.mxu1 }
 0x221   :  { %v334_v44 = vpop.f32.mrf.mxu3 }
 0x222   :  { %v337_v46 = vadd.f32 %v334_v44, %v262_v43  ;;  %v845_v44 = vld [vmem:[%s1322_s20] ss:$0 sm:$0xff]  ;;  %s748_s20 = sshll.u32 %s880_s19, 4  ;;  %s749_s20 = int_to_ptr.vmem [resolvable:$true] %s748_s20 }
 0x224   :  { %v411_v48 = vadd.f32 %v408_v45, %v337_v46  ;;  %v708_v46 = vshrl.u32 %v71_v22, 7 }
 0x226   :  { %v416_v49 = vadd.f32 %v838_v47, %v411_v48  ;;  %vm712_vm14 = vcmp.lt.s32.totalorder %v708_v46, 2 }
 0x228   :  { %v417_v50 = vmax.f32 %v416_v49, 0.0 }
 0x22a   :  { %800 = vmatmul.msk.f32.vlgmr.msra.gmra.mxu3 %vm217_vm10, %v417_v50 }
 0x22b   :  { %664 = vmatpush.msra.mxu3 %v644_v24 }
 0x22d   :  { %665 = vmatpush.msra.mxu3 %v643_v25 }
 0x22f   :  { %666 = vmatpush.msra.mxu3 %v642_v26 }
 0x231   :  { %667 = vmatpush.msra.mxu3 %v641_v27 }
 0x232   :  { %806 = vmatmul.msk.f32.vlgmr.msrb.gmra.mxu3 %vm489_vm12, %v483_v51 }
 0x2ad   :  { %v446_v61 = vpop.f32.mrf.mxu3 }
 0x2ae   :  { %v447_v62 = vadd.f32 %v839_v60, %v446_v61 }
 0x2b0   :  { %v449_v63 = vmax.f32 %v447_v62, 0.0 }
 0x2b2   :  { %801 = vmatmul.msk.f32.vlgmr.msra.gmra.mxu1 %vm217_vm10, %v449_v63 }
 0x2b5   :  { %v539_v2 = vpop.f32.mrf.mxu3 }
 0x2b6   :  { %v540_v3 = vadd.f32 %v539_v2, %v513_v0 }
 0x2b8   :  { %v546_v4 = vadd.f32 %v840_v1, %v540_v3 }
 0x2ba   :  { %v547_v6 = vmax.f32 %v546_v4, 0.0 }
 0x2bc   :  { %807 = vmatmul.msk.f32.vlgmr.msra.gmra.mxu0 %vm217_vm10, %v547_v6 }
 0x32f   :  { %v478_v15 = vpop.f32.mrf.mxu1 }
 0x330   :  { %v479_v16 = vadd.f32 %v841_v14, %v478_v15 }
 0x332   :  { %v481_v17 = vmax.f32 %v479_v16, 0.0 }
 0x334   :  { %809 = vmatmul.msk.f32.vlgmr.msrb.gmra.mxu2 %vm217_vm10, %v481_v17 }
 0x339   :  { %v576_v19 = vpop.f32.mrf.mxu0 }
 0x33a   :  { %v577_v20 = vadd.f32 %v842_v18, %v576_v19 }
 0x33c   :  { %v579_v21 = vadd.f32 %v577_v20, %v547_v6 }
 0x33e   :  { %v580_v23 = vmax.f32 %v579_v21, 0.0 }
 0x340   :  { %808 = vmatmul.msk.f32.vlgmr.msrb.gmra.mxu1 %vm217_vm10, %v580_v23 }
 0x3b7   :  { %v632_v31 = vpop.f32.mrf.mxu2 }
 0x3bd   :  { %v609_v32 = vpop.f32.mrf.mxu1 }
 0x3be   :  { %v633_v33 = vadd.f32 %v632_v31, %v609_v32 }
 0x3c0   :  { %v639_v34 = vadd.f32 %v843_v30, %v633_v33 }
 0x3c2   :  { %v640_v35 = vmax.f32 %v639_v34, 0.0 }
 0x3c4   :  { %810 = vmatmul.msk.f32.vlgmr.msra.gmra.mxu3 %vm217_vm10, %v640_v35 }
 0x447   :  { %v669_v40 = vpop.f32.mrf.mxu3 }
 0x448   :  { %v670_v41 = vadd.f32 %v844_v39, %v669_v40 }
 0x44a   :  { %v672_v42 = vadd.f32 %v670_v41, %v640_v35 }
 0x44c   :  { %v673_v43 = vmax.f32 %v672_v42, 0.0 }
 0x44e   :  { %811 = vmatmul.msk.f32.vlgmr.msrb.gmra.mxu0 %vm217_vm10, %v673_v43 }
 0x4cb   :  { %v702_v45 = vpop.f32.mrf.mxu0 }
 0x4cc   :  { %v703_v47 = vadd.f32 %v845_v44, %v702_v45 }
 0x4ce   :  { %v705_v48 = vadd.f32 %v703_v47, %v673_v43 }
 0x4d0   :  { %v706_v49 = vmax.f32 %v705_v48, 0.0 }
 0x4d2   :  { %v713_v50 = vsel %vm712_vm14, %v706_v49, 0.0 }
 0x4d3   :  { %v714_v5 = vsel %vm217_vm10, %v713_v50, 0.0  ;;  %v724_v51 = vmul.f32 %v713_v50, %v706_v49 }
 0x4d4   :  { %715 = vadd.xlane.f32.xlu1 %v714_v5 }
 0x4d5   :  { %v725_v52 = vsel %vm217_vm10, %v724_v51, 0.0 }
 0x4d6   :  { %726 = vadd.xlane.f32.xlu2 %v725_v52 }
 0x547   :  { %v716_v53 = vpop.xlane.xlu1 %715 }
 0x548   :  { %v717_v54 = vrot.slane %v716_v53, 4 }
 0x549   :  { %v727_v55 = vpop.xlane.xlu2 %726 }
 0x54a   :  { %v718_v56 = vadd.f32 %v717_v54, %v716_v53  ;;  %v728_v57 = vrot.slane %v727_v55, 4 }
 0x54c   :  { %v719_v58 = vrot.slane %v718_v56, 2  ;;  %v729_v59 = vadd.f32 %v728_v57, %v727_v55 }
 0x54e   :  { %v730_v22 = vrot.slane %v729_v59, 2  ;;  %v720_v60 = vadd.f32 %v719_v58, %v718_v56 }
 0x550   :  { %v731_v61 = vadd.f32 %v730_v22, %v729_v59  ;;  %v721_v62 = vrot.slane %v720_v60, 1 }
 0x552   :  { %v722_v63 = vadd.f32 %v721_v62, %v720_v60  ;;  %v732_v0 = vrot.slane %v731_v61, 1 }
 0x554   :  { %812 = vpush %v722_v63  ;;  %v733_v1 = vadd.f32 %v732_v0, %v731_v61 }
 0x556   :  { %814 = vpush %v733_v1 }
 0x585   :  { %s813_s18 = spop %812 }
 0x586   :  { %v736_v2 = vstv %s813_s18 }
 0x587   :  { %s815_s23 = spop %814  ;;  %v737_v4 = vsel %vm735_vm15, %v736_v2, 0.0 }
 0x588   :  { %v739_v3 = vstv %s815_s23 }
 0x589   :  { %v740_v6 = vsel %vm738_vm0, %v739_v3, 0.0 }
 0x58a   :  { %v741_v7 = vadd.f32 %v740_v6, %v737_v4 }
 0x58c   :  { %742 = vst [vmem:[#allocation2] sm:$0xff] %v741_v7 }
 0x58d   :  { %753 = dma.vmem_to_hbm [thread:$0]  %s749_s20, 128, %s751_s7, [#allocation3]  }
 0x58e   :  { %870 = dma.done.wait [#allocation3], 128  }
 0x58f   :  { %871 = vsyncadd [#allocation3], 4294967168 }
 0x590   :  { %758 = vsyncpa [#allocation3], 1 }

</bundles_post_ra>
